<compile_context>
chip_gen: v5e
topology: v5e:2x2
jax: 0.10.0
libtpu: 0.0.40
codegen_flags: <defaults>
</compile_context>

<pallas_src>
import functools

import jax
import jax.numpy as jnp
from jax import lax
from jax.experimental import pallas as pl
from jax.experimental.pallas import tpu as pltpu


# -----------------------------------------------------------------------------
# Helpers
# -----------------------------------------------------------------------------
@functools.lru_cache(maxsize=None)
def _vmem_limit_bytes():
    """Scoped-VMEM budget: ~3/4 of physical, capped (128 MiB v5e/v6e -> 96 MiB,
    64 MiB v7x -> 48 MiB). Falls back to 48 MiB if the query is unavailable."""
    cap = 64 * 1024 * 1024
    try:
        cap = pltpu.get_tpu_info().vmem_capacity_bytes
    except Exception:
        pass
    return int(min(100 * 1024 * 1024, cap * 3 // 4))


def _fit_tile(dim, pref, align):
    """Largest tile <= pref that divides `dim` and is a multiple of `align`.
    Falls back to the full dim (always a legal block) only if nothing fits."""
    if dim <= pref:
        return dim
    t = (pref // align) * align
    while t >= align:
        if dim % t == 0:
            return t
        t -= align
    # TODO(synk): for awkward dims (> pref, no aligned divisor) switch to a
    # pl.cdiv grid with edge masking instead of one giant block (VMEM hazard,
    # especially on v7x with only 64 MiB physical VMEM).
    return dim


def _heads_per_group(num_heads, head_dim):
    """Smallest head group whose lane width (g*head_dim) is a multiple of 128;
    fall back to all heads (block == full lane dim, always legal)."""
    for g in range(1, num_heads + 1):
        if num_heads % g == 0 and (g * head_dim) % 128 == 0:
            return g
    return num_heads


# -----------------------------------------------------------------------------
# Tiled linear (MXU matmul, f32 accumulator, in-kernel bf16 cast of inputs)
# -----------------------------------------------------------------------------
def _matmul_kernel(x_ref, w_ref, o_ref, acc_ref):
    @pl.when(pl.program_id(2) == 0)
    def _():
        acc_ref[...] = jnp.zeros_like(acc_ref)

    # Cast on the VMEM tile (VPU slack under MXU work); no-op if already bf16.
    acc_ref[...] += jnp.dot(x_ref[...].astype(jnp.bfloat16),
                            w_ref[...].astype(jnp.bfloat16),
                            preferred_element_type=jnp.float32)

    @pl.when(pl.program_id(2) == pl.num_programs(2) - 1)
    def _():
        o_ref[...] = acc_ref[...].astype(o_ref.dtype)


def linear(x2d, w, *, out_dtype=jnp.bfloat16, tm=512, tn=1024, tk=512):
    """x2d: [M, K], w: [K, N] -> [M, N]; bf16 MXU inputs, f32 accumulation."""
    M, K = x2d.shape
    K2, N = w.shape
    assert K == K2
    tm = _fit_tile(M, tm, 8)
    tn = _fit_tile(N, tn, 128)
    tk = _fit_tile(K, tk, 128)
    return pl.pallas_call(
        _matmul_kernel,
        out_shape=jax.ShapeDtypeStruct((M, N), out_dtype),
        grid=(M // tm, N // tn, K // tk),
        in_specs=[pl.BlockSpec((tm, tk), lambda i, j, k: (i, k)),
                  pl.BlockSpec((tk, tn), lambda i, j, k: (k, j))],
        out_specs=pl.BlockSpec((tm, tn), lambda i, j, k: (i, j)),
        scratch_shapes=[pltpu.VMEM((tm, tn), jnp.float32)],
        compiler_params=pltpu.CompilerParams(
            dimension_semantics=("parallel", "parallel", "arbitrary"),
            vmem_limit_bytes=_vmem_limit_bytes()),
    )(x2d, w)


# -----------------------------------------------------------------------------
# Attention kernel: one (batch, head-group, q-tile) per grid step,
# [B, L, H*C] layout, bias/mask applied in-kernel, bf16 output.
# -----------------------------------------------------------------------------
def _attn_kernel(*refs, heads, head_dim, has_bias, has_mask):
    it = iter(refs)
    q_ref, k_ref, v_ref = next(it), next(it), next(it)
    bias_ref = next(it) if has_bias else None
    mask_ref = next(it) if has_mask else None
    o_ref = next(it)

    q = q_ref[0]                      # [tq, hpg*C]  bf16
    k = k_ref[0]                      # [L2, hpg*C]  bf16
    v = v_ref[0]                      # [L2, hpg*C]  bf16

    if has_mask:
        # Hoisted out of the per-head loop: 0 / -inf additive bias.
        km = mask_ref[0, 0]           # [1 or tq, L2] int32
        neg = jnp.float32(jnp.finfo(jnp.float32).min)
        add_mask = jnp.where(km == 0, neg, jnp.float32(0.0))

    for h in range(heads):            # static unroll over the head group
        lo, hi = h * head_dim, (h + 1) * head_dim
        qh, kh, vh = q[:, lo:hi], k[:, lo:hi], v[:, lo:hi]
        # T5: NO 1/sqrt(head_dim) scaling. Contract last dims (no explicit k.T).
        s = lax.dot_general(qh, kh, (((1,), (1,)), ((), ())),
                            preferred_element_type=jnp.float32)     # [tq, L2]
        if has_bias:
            s = s + bias_ref[0, h].astype(jnp.float32)              # bf16 ok
        if has_mask:
            s = s + add_mask
        s = s - jnp.max(s, axis=-1, keepdims=True)
        p = jnp.exp(s)
        # EUP approx reciprocal (~2^-12 rel) — deliberate divergence vs torch.
        p = p * pl.reciprocal(jnp.sum(p, axis=-1, keepdims=True), approx=True)
        oh = lax.dot_general(p.astype(vh.dtype), vh,
                             (((1,), (0,)), ((), ())),
                             preferred_element_type=jnp.float32)    # [tq, C]
        # Direct per-head store — no concatenate temporary.
        o_ref[0, :, lo:hi] = oh.astype(o_ref.dtype)


def attention(arrays, lane_offsets, pos_bias, mask4, *, num_heads, head_dim,
              L1, L2, out_dtype=jnp.bfloat16, tq_pref=512):
    """arrays = (q_arr, k_arr, v_arr): each [B, L, lane_dim] bf16; may be the
    SAME fused buffer with different lane block offsets (`lane_offsets`, in
    units of head-group blocks).  pos_bias: [1|B, H, L1, L2] (f32 or bf16) or
    None.  mask4: [B, 1, 1|L1, L2] int32 or None.  Returns [B, L1, H*C]."""
    q_arr, k_arr, v_arr = arrays
    B = q_arr.shape[0]
    C = head_dim
    D = num_heads * C
    hpg = _heads_per_group(num_heads, C)
    G = num_heads // hpg                       # number of head groups
    tq = _fit_tile(L1, tq_pref, 8)
    nq = L1 // tq

    bias_bcast = pos_bias is not None and pos_bias.shape[0] == 1
    if bias_bcast:
        # Innermost axis = batch -> broadcast bias block index is constant
        # across it and Pallas skips the re-DMA (B-fold less bias traffic).
        grid = (G, nq, B)
        wrap = lambda f: (lambda g, qi, b: f(b, g, qi))
    else:
        # Innermost axis = q-tile -> K/V block index constant across it.
        grid = (B, G, nq)
        wrap = lambda f: (lambda b, g, qi: f(b, g, qi))

    qo, ko, vo = lane_offsets
    inputs = [q_arr, k_arr, v_arr]
    in_specs = [
        pl.BlockSpec((1, tq, hpg * C), wrap(lambda b, g, qi: (b, qi, qo + g))),
        pl.BlockSpec((1, L2, hpg * C), wrap(lambda b, g, qi: (b, 0, ko + g))),
        pl.BlockSpec((1, L2, hpg * C), wrap(lambda b, g, qi: (b, 0, vo + g))),
    ]
    if pos_bias is not None:
        inputs.append(pos_bias)                # bf16 recommended; upcast in-kernel
        if bias_bcast:
            bidx = lambda b, g, qi: (0, g, qi, 0)
        else:
            bidx = lambda b, g, qi: (b, g, qi, 0)
        in_specs.append(pl.BlockSpec((1, hpg, tq, L2), wrap(bidx)))
    if mask4 is not None:
        inputs.append(mask4)
        if mask4.shape[2] == 1:
            in_specs.append(
                pl.BlockSpec((1, 1, 1, L2), wrap(lambda b, g, qi: (b, 0, 0, 0))))
        else:
            in_specs.append(
                pl.BlockSpec((1, 1, tq, L2), wrap(lambda b, g, qi: (b, 0, qi, 0))))

    kernel = functools.partial(
        _attn_kernel, heads=hpg, head_dim=C,
        has_bias=pos_bias is not None, has_mask=mask4 is not None)

    return pl.pallas_call(
        kernel,
        out_shape=jax.ShapeDtypeStruct((B, L1, D), out_dtype),
        grid=grid,
        in_specs=in_specs,
        out_specs=pl.BlockSpec((1, tq, hpg * C),
                               wrap(lambda b, g, qi: (b, qi, g))),
        compiler_params=pltpu.CompilerParams(
            dimension_semantics=("parallel", "parallel", "parallel"),
            vmem_limit_bytes=_vmem_limit_bytes()),
    )(*inputs)


# -----------------------------------------------------------------------------
# Parameter prep (ONE-TIME weight fuse + bf16 cast) and T5Attention forward
# -----------------------------------------------------------------------------
def prepare_t5_attention_params(params, dtype=jnp.bfloat16):
    """Fuse + cast projection weights once (avoids per-call concatenate/astype
    HBM passes).  Weights are [in, out] (transposed vs. PyTorch nn.Linear)."""
    wq, wk, wv, wo = params["wq"], params["wk"], params["wv"], params["wo"]
    return {
        "wq": wq.astype(dtype),
        "w_qkv": jnp.concatenate([wq, wk, wv], axis=1).astype(dtype),
        "w_kv": jnp.concatenate([wk, wv], axis=1).astype(dtype),
        "wo": wo.astype(dtype),
    }


def t5_attention(x, params, num_heads, context=None, mask=None, pos_bias=None):
    """
    x:        [B, L1, dim]
    context:  [B, L2, dim] or None
    mask:     [B, L2] or [B, L1, L2] or None
    pos_bias: [1|B, H, L1, L2] (f32 or bf16) or None
    params:   output of prepare_t5_attention_params()
    returns   [B, L1, dim] float32
    """
    b, l1, dim = x.shape
    dim_attn = params["wq"].shape[1]
    C = dim_attn // num_heads
    hpg = _heads_per_group(num_heads, C)
    G = num_heads // hpg
    fused_ok = (hpg * C) % 128 == 0   # lane-offset BlockSpecs need 128-aligned width

    x2d = x.reshape(b * l1, dim)
    if context is None:
        l2 = l1
        # Fused QKV projection: x read once, one fat MXU matmul.
        qkv = linear(x2d, params["w_qkv"], out_dtype=jnp.bfloat16)   # [M, 3*Da]
        if fused_ok:
            qkv3 = qkv.reshape(b, l1, 3 * dim_attn)
            arrays = (qkv3, qkv3, qkv3)          # same buffer, lane offsets below
            offsets = (0, G, 2 * G)
        else:
            q2d, k2d, v2d = jnp.split(qkv, 3, axis=1)   # tiny-shape fallback
            arrays = tuple(a.reshape(b, l1, dim_attn) for a in (q2d, k2d, v2d))
            offsets = (0, 0, 0)
    else:
        l2 = context.shape[1]
        q3 = linear(x2d, params["wq"],
                    out_dtype=jnp.bfloat16).reshape(b, l1, dim_attn)
        kv = linear(context.reshape(b * l2, dim), params["w_kv"],
                    out_dtype=jnp.bfloat16)                          # [M2, 2*Da]
        if fused_ok:
            kv3 = kv.reshape(b, l2, 2 * dim_attn)
            arrays = (q3, kv3, kv3)
            offsets = (0, 0, G)
        else:
            k2d, v2d = jnp.split(kv, 2, axis=1)
            arrays = (q3, k2d.reshape(b, l2, dim_attn),
                      v2d.reshape(b, l2, dim_attn))
            offsets = (0, 0, 0)

    mask4 = None
    if mask is not None:
        assert mask.ndim in (2, 3)
        mask4 = (mask.reshape(b, 1, 1, l2) if mask.ndim == 2
                 else mask[:, None, :, :]).astype(jnp.int32)

    o = attention(arrays, offsets, pos_bias, mask4,
                  num_heads=num_heads, head_dim=C, L1=l1, L2=l2)  # bf16 [B,L1,Da]
    out = linear(o.reshape(b * l1, dim_attn), params["wo"],
                 out_dtype=jnp.float32).reshape(b, l1, dim)
    # TODO(synk): nn.Dropout(p=0.1) omitted — identity in eval/inference mode.
    return out


# -----------------------------------------------------------------------------
# Pure-JAX reference mirroring the kernel's bf16-input / f32-accumulate policy
# -----------------------------------------------------------------------------
def t5_attention_ref(x, raw_params, num_heads, context=None, mask=None,
                     pos_bias=None):
    wq, wk, wv, wo = (raw_params[k] for k in ("wq", "wk", "wv", "wo"))
    context = x if context is None else context
    b, l1, dim = x.shape
    l2 = context.shape[1]
    dim_attn = wq.shape[1]
    c = dim_attn // num_heads
    bf, f32 = jnp.bfloat16, jnp.float32

    def mm(a, w):
        return jnp.einsum("bld,dn->bln", a.astype(bf), w.astype(bf),
                          preferred_element_type=f32)

    q = mm(x, wq).astype(bf).reshape(b, l1, num_heads, c)
    k = mm(context, wk).astype(bf).reshape(b, l2, num_heads, c)
    v = mm(context, wv).astype(bf).reshape(b, l2, num_heads, c)

    s = jnp.einsum("binc,bjnc->bnij", q, k, preferred_element_type=f32)
    if pos_bias is not None:
        s = s + pos_bias.astype(f32)
    if mask is not None:
        m = mask.reshape(b, 1, 1, l2) if mask.ndim == 2 else mask[:, None, :, :]
        s = jnp.where(m == 0, jnp.finfo(f32).min, s)
    p = jax.nn.softmax(s, axis=-1)
    o = jnp.einsum("bnij,bjnc->binc", p.astype(bf), v,
                   preferred_element_type=f32).reshape(b, l1, dim_attn)
    return jnp.einsum("bld,dn->bln", o.astype(bf), wo.astype(bf),
                      preferred_element_type=f32)


# -----------------------------------------------------------------------------
# Main
# -----------------------------------------------------------------------------
if __name__ == "__main__":
    key = jax.random.PRNGKey(0)
    k1, k2 = jax.random.split(key)

    # ---- Config 1: tiny dims (split-fallback path, per-batch bias, 2-D mask)
    B, L, DIM, DIM_ATTN, NUM_HEADS = 2, 8, 32, 32, 4
    kx, kq, kk, kv, ko, kb, km = jax.random.split(k1, 7)
    x1 = jax.random.normal(kx, (B, L, DIM), jnp.float32)
    raw1 = {
        "wq": jax.random.normal(kq, (DIM, DIM_ATTN), jnp.float32) * 0.05,
        "wk": jax.random.normal(kk, (DIM, DIM_ATTN), jnp.float32) * 0.05,
        "wv": jax.random.normal(kv, (DIM, DIM_ATTN), jnp.float32) * 0.05,
        "wo": jax.random.normal(ko, (DIM_ATTN, DIM), jnp.float32) * 0.05,
    }
    p1 = prepare_t5_attention_params(raw1)
    bias1 = jax.random.normal(kb, (B, NUM_HEADS, L, L), jnp.float32) * 0.1
    mask1 = (jax.random.uniform(km, (B, L)) > 0.2).astype(jnp.int32)
    mask1 = mask1.at[:, 0].set(1)   # keep at least one valid key per row

    out1 = jax.block_until_ready(
        t5_attention(x1, p1, NUM_HEADS, mask=mask1, pos_bias=bias1))
    ref1 = jax.block_until_ready(
        t5_attention_ref(x1, raw1, NUM_HEADS, mask=mask1, pos_bias=bias1))
    assert out1.shape == (B, L, DIM)
    assert jnp.allclose(out1, ref1, atol=5e-3, rtol=5e-2), "config-1 mismatch"

    # ---- Config 2: 128-aligned heads (fused-QKV path, broadcast bf16 bias,
    #                3-D mask) + a cross-attention call (fused-KV path)
    B2, L1b, DIM2, DIM_ATTN2, NUM_HEADS2 = 2, 16, 256, 256, 2
    kx, kq, kk, kv, ko, kb, km, kc, kmc = jax.random.split(k2, 9)
    x2 = jax.random.normal(kx, (B2, L1b, DIM2), jnp.float32)
    raw2 = {
        "wq": jax.random.normal(kq, (DIM2, DIM_ATTN2), jnp.float32) * 0.05,
        "wk": jax.random.normal(kk, (DIM2, DIM_ATTN2), jnp.float32) * 0.05,
        "wv": jax.random.normal(kv, (DIM2, DIM_ATTN2), jnp.float32) * 0.05,
        "wo": jax.random.normal(ko, (DIM_ATTN2, DIM2), jnp.float32) * 0.05,
    }
    p2 = prepare_t5_attention_params(raw2)
    bias2 = (jax.random.normal(kb, (1, NUM_HEADS2, L1b, L1b), jnp.float32)
             * 0.1).astype(jnp.bfloat16)          # bf16 pos_bias, upcast in-kernel
    mask2 = (jax.random.uniform(km, (B2, L1b, L1b)) > 0.2).astype(jnp.int32)
    mask2 = mask2.at[:, :, 0].set(1)

    out2 = jax.block_until_ready(
        t5_attention(x2, p2, NUM_HEADS2, mask=mask2, pos_bias=bias2))
    ref2 = jax.block_until_ready(
        t5_attention_ref(x2, raw2, NUM_HEADS2, mask=mask2, pos_bias=bias2))
    assert out2.shape == (B2, L1b, DIM2)
    assert jnp.allclose(out2, ref2, atol=1e-2, rtol=5e-2), "config-2 mismatch"

    LC = 24
    ctx = jax.random.normal(kc, (B2, LC, DIM2), jnp.float32)
    maskc = (jax.random.uniform(kmc, (B2, LC)) > 0.2).astype(jnp.int32)
    maskc = maskc.at[:, 0].set(1)
    out3 = jax.block_until_ready(
        t5_attention(x2, p2, NUM_HEADS2, context=ctx, mask=maskc))
    ref3 = jax.block_until_ready(
        t5_attention_ref(x2, raw2, NUM_HEADS2, context=ctx, mask=maskc))
    assert out3.shape == (B2, L1b, DIM2)
    assert jnp.allclose(out3, ref3, atol=1e-2, rtol=5e-2), "cross-attn mismatch"

    print("KERNEL_OK")
</pallas_src>

<mosaic_0001>
module attributes {stable_mosaic.version = 11 : i64} {
  func.func @_matmul_kernel(%arg0: i32, %arg1: i32, %arg2: i32, %arg3: memref<16x32xf32, #tpu.memory_space<vmem>>, %arg4: memref<32x96xbf16, #tpu.memory_space<vmem>>, %arg5: memref<16x96xbf16, #tpu.memory_space<vmem>>, %arg6: memref<16x96xf32, #tpu.memory_space<vmem>>) attributes {dimension_semantics = [#tpu.dimension_semantics<parallel>, #tpu.dimension_semantics<parallel>, #tpu.dimension_semantics<arbitrary>], iteration_bounds = array<i64: 1, 1, 1>, scalar_prefetch = 0 : i64, scratch_operands = 1 : i64, tpu.core_type = #tpu.core_type<tc>, window_params = [{transform_indices = @transform_0, window_bounds = array<i64: 16, 32>}, {transform_indices = @transform_1, window_bounds = array<i64: 32, 96>}, {transform_indices = @transform_2, window_bounds = array<i64: 16, 96>}]} {
    %c0_i32 = arith.constant 0 : i32
    %0 = arith.cmpi eq, %arg2, %c0_i32 : i32
    %1 = arith.extui %0 : i1 to i32
    %c0_i32_0 = arith.constant 0 : i32
    %2 = arith.cmpi ne, %1, %c0_i32_0 : i32
    scf.if %2 {
      %cst_10 = arith.constant 0.000000e+00 : f32
      %13 = vector.broadcast %cst_10 : f32 to vector<16x96xf32>
      %c0_11 = arith.constant 0 : index
      %c0_12 = arith.constant 0 : index
      %14 = vector.load %arg6[%c0_11, %c0_12] : memref<16x96xf32, #tpu.memory_space<vmem>>, vector<16x96xf32>
      tpu.vector_store %arg6[%c0_11, %c0_12], %13 {strides = array<i32>} : memref<16x96xf32, #tpu.memory_space<vmem>>, vector<16x96xf32>,
    } else {
    }
    %c0 = arith.constant 0 : index
    %c0_1 = arith.constant 0 : index
    %3 = vector.load %arg6[%c0, %c0_1] : memref<16x96xf32, #tpu.memory_space<vmem>>, vector<16x96xf32>
    %c0_2 = arith.constant 0 : index
    %c0_3 = arith.constant 0 : index
    %4 = vector.load %arg3[%c0_2, %c0_3] : memref<16x32xf32, #tpu.memory_space<vmem>>, vector<16x32xf32>
    %5 = arith.truncf %4 : vector<16x32xf32> to vector<16x32xbf16>
    %c0_4 = arith.constant 0 : index
    %c0_5 = arith.constant 0 : index
    %6 = vector.load %arg4[%c0_4, %c0_5] : memref<32x96xbf16, #tpu.memory_space<vmem>>, vector<32x96xbf16>
    %cst = arith.constant dense<0.000000e+00> : vector<16x96xf32>
    %7 = tpu.matmul %5, %6, %cst {dimension_numbers = #tpu.dot_dimension_numbers<[1], [0], [0], [1], [0, 0, 1, 1], [], []>} : vector<16x32xbf16>, vector<32x96xbf16>, vector<16x96xf32> -> vector<16x96xf32>
    %8 = arith.addf %3, %7 : vector<16x96xf32>
    %c0_6 = arith.constant 0 : index
    %c0_7 = arith.constant 0 : index
    %9 = vector.load %arg6[%c0_6, %c0_7] : memref<16x96xf32, #tpu.memory_space<vmem>>, vector<16x96xf32>
    tpu.vector_store %arg6[%c0_6, %c0_7], %8 {strides = array<i32>} : memref<16x96xf32, #tpu.memory_space<vmem>>, vector<16x96xf32>,
    %c0_i32_8 = arith.constant 0 : i32
    %10 = arith.cmpi eq, %arg2, %c0_i32_8 : i32
    %11 = arith.extui %10 : i1 to i32
    %c0_i32_9 = arith.constant 0 : i32
    %12 = arith.cmpi ne, %11, %c0_i32_9 : i32
    scf.if %12 {
      %c0_10 = arith.constant 0 : index
      %c0_11 = arith.constant 0 : index
      %13 = vector.load %arg6[%c0_10, %c0_11] : memref<16x96xf32, #tpu.memory_space<vmem>>, vector<16x96xf32>
      %14 = arith.truncf %13 : vector<16x96xf32> to vector<16x96xbf16>
      %c0_12 = arith.constant 0 : index
      %c0_13 = arith.constant 0 : index
      %15 = vector.load %arg5[%c0_12, %c0_13] : memref<16x96xbf16, #tpu.memory_space<vmem>>, vector<16x96xbf16>
      tpu.vector_store %arg5[%c0_12, %c0_13], %14 {strides = array<i32>} : memref<16x96xbf16, #tpu.memory_space<vmem>>, vector<16x96xbf16>,
    } else {
    }
    return
  }
  func.func @transform_0(%arg0: i32, %arg1: i32, %arg2: i32) -> (i32, i32) {
    %c0_i32 = arith.constant 0 : i32
    return %arg0, %arg2 : i32, i32
  }
  func.func @transform_1(%arg0: i32, %arg1: i32, %arg2: i32) -> (i32, i32) {
    %c0_i32 = arith.constant 0 : i32
    return %arg2, %arg1 : i32, i32
  }
  func.func @transform_2(%arg0: i32, %arg1: i32, %arg2: i32) -> (i32, i32) {
    %c0_i32 = arith.constant 0 : i32
    return %arg0, %arg1 : i32, i32
  }
}

</mosaic_0001>

<bundles_post_ra>
// kernel: tpu_custom_call.1
= control target key start
LH: loop header
LB: loop body
LE: loop exit
PB: predicated region body
PF: predicated region fallthrough
CT: control target
= control target key end

     0   :  { %7 = vsyncpa [#allocation4], 0  ;;  %s265_s0 = inlined_call_operand.hbm [shape: f32[16,32], index: 0, kind: input, shape index: {}]   ;;  %s266_s1 = inlined_call_operand.hbm [shape: bf16[32,96], index: 1, kind: input, shape index: {}]   ;;  %s267_s2 = inlined_call_operand.hbm [shape: bf16[16,96], index: 2, kind: output, shape index: {}]  }
   0x1   :  { %8 = vsyncpa [#allocation7], 0 }
   0x2   :  { %9 = vsyncpa [#allocation5], 0  ;;  %s14_s11 = sshll.u32 %s265_s0, 4  ;;  %s223_s12 = smov [#allocation3]   ;;  %s15_s11 = int_to_ptr.hbm [resolvable:$true] %s14_s11 }
   0x3   :  { %s16_s13 = sshll.u32 %s223_s12, 4  ;;  %s27_s16 = sshll.u32 %s266_s1, 4  ;;  %s17_s13 = int_to_ptr.vmem [resolvable:$true] %s16_s13  ;;  %s28_s16 = int_to_ptr.hbm [resolvable:$true] %s27_s16 }
   0x4   :  { %s224_s17 = smov 128   ;;  %s225_s18 = smov 8  }
   0x5   :  { %22 = dma.hbm_to_vmem [thread:$0]  %s15_s11, 256, %s17_s13, [#allocation4], %s224_s17, %s224_s17, %s225_s18  }
   0x6   :  { %s226_s19 = smov [#allocation6]   ;;  %s227_s21 = smov 64  }
   0x7   :  { %s29_s20 = sshll.u32 %s226_s19, 4  ;;  %s228_s22 = smov 4   ;;  %s30_s20 = int_to_ptr.vmem [resolvable:$true] %s29_s20 }
   0x8   :  { %35 = dma.hbm_to_vmem [thread:$0]  %s28_s16, 256, %s30_s20, [#allocation7], %s227_s21, %s227_s21, %s228_s22  }
   0x9   :  { %217 = dma.done.wait [#allocation4], 256  }
   0xa   :  { %218 = vsyncadd [#allocation4], 4294967040 }
   0xb   :  { %219 = dma.done.wait [#allocation7], 256  }
   0xc   :  { %220 = vsyncadd [#allocation7], 4294967040  ;;  %vm49_vm0 = vcmask 785408   ;;  %v229_v0 = vmov 0.0   ;;  %v136_v1 = vld [vmem:[#allocation6 + $0x8] sm:$0xff]  ;;  %v135_v2 = vld [vmem:[#allocation6] sm:$0xff] }
   0xd   :  { %50 = vst.msk [vmem:[#allocation2] sm:$0xff] %vm49_vm0, %v229_v0  ;;  %83 = vmatpush.bf16.msra.mxu0 %v136_v1  ;;  %v54_v3 = vld [vmem:[#allocation3] sm:$0xff]  ;;  %v55_v4 = vld [vmem:[#allocation3 + $0x8] sm:$0xff]  ;;  %vm73_vm1 = vcmask 261120   ;;  %vm103_vm2 = vcmask 781312   ;;  %s230_s0 = smov [#allocation8]  }
   0xe   :  { %51 = vst.msk [vmem:[#allocation2 + $0x8] sm:$0xff] %vm49_vm0, %v229_v0  ;;  %v56_v5 = vpack.c.bf16 %v55_v4, %v54_v3  ;;  %s110_s1 = sshll.u32 %s230_s0, 4  ;;  %s112_s25 = sshll.u32 %s267_s2, 4  ;;  %s111_s1 = int_to_ptr.vmem [resolvable:$true] %s110_s1  ;;  %s113_s25 = int_to_ptr.hbm [resolvable:$true] %s112_s25 }
  0x11   :  { %84 = vmatpush.bf16.msra.mxu0 %v135_v2 }
  0x14   :  { %134 = vmatmul.msk.bf16.vlgmr.msra.gmra.mxu0 %vm73_vm1, %v56_v5  ;;  %v52_v6 = vld [vmem:[#allocation2] sm:$0xff] }
  0x15   :  { %v53_v9 = vld [vmem:[#allocation2 + $0x8] sm:$0xff] }
  0x91   :  { %v86_v7 = vpop.f32.mrf.mxu0 }
  0x92   :  { %v91_v8 = vadd.f32 %v86_v7, %v52_v6 }
  0x94   :  { %94 = vst.msk [vmem:[#allocation2] sm:$0xff] %vm49_vm0, %v91_v8 }
  0x99   :  { %v88_v10 = vpop.f32.mrf.mxu0 }
  0x9a   :  { %v92_v11 = vadd.f32 %v88_v10, %v53_v9 }
  0x9b   :  { %v99_v12 = vld [vmem:[#allocation2] sm:$0xff] }
  0x9c   :  { %95 = vst.msk [vmem:[#allocation2 + $0x8] sm:$0xff] %vm49_vm0, %v92_v11  ;;  %v101_v13 = vpack.c.bf16 %v99_v12, %v99_v12 }
  0x9e   :  { %104 = vst.msk [vmem:[#allocation8] sm:$0xf] %vm103_vm2, %v101_v13 }
  0xa3   :  { %v100_v14 = vld [vmem:[#allocation2 + $0x8] sm:$0xff] }
  0xa4   :  { %v102_v15 = vpack.c.bf16 %v100_v14, %v100_v14 }
  0xa6   :  { %105 = vst.msk [vmem:[#allocation8 + $0x4] sm:$0xf] %vm103_vm2, %v102_v15 }
  0xa7   :  { %118 = dma.vmem_to_hbm [thread:$0]  %s111_s1, 128, %s113_s25, [#allocation5], %s227_s21, %s227_s21, %s228_s22  }
  0xa8   :  { %221 = dma.done.wait [#allocation5], 128  }
  0xa9   :  { %222 = vsyncadd [#allocation5], 4294967168 }
  0xaa   :  { %123 = vsyncpa [#allocation4], 1 }
  0xab   :  { %124 = vsyncpa [#allocation7], 1 }
  0xac   :  { %125 = vsyncpa [#allocation5], 1 }

</bundles_post_ra>
